<compile_context>
chip_gen: v6e
topology: v6e:2x2x1
jax: 0.10.0
libtpu: 0.0.40
codegen_flags: <defaults>
</compile_context>

<pallas_src>
import jax
import jax.numpy as jnp
from jax.experimental import pallas as pl
from jax.experimental.pallas import tpu as pltpu


def _make_policy_kernel(mxu_dtype, act_dtype):
    """Build the fused MLP + softmax kernel for one batch tile."""

    def policy_kernel(x_ref, w1_ref, b1_ref, w2_ref, b2_ref, w3_ref, b3_ref,
                      o_ref):
        # states arrive as f32; cast to the MXU operand dtype in-register so
        # the wrapper never launches a separate HBM cast pass.
        x = x_ref[...].astype(mxu_dtype)

        # hidden layer 1: MXU matmul, f32 accumulate, elementwise in act_dtype
        h1 = jnp.dot(x, w1_ref[...], preferred_element_type=jnp.float32)
        h1 = jnp.maximum(h1.astype(act_dtype) + b1_ref[...], 0)

        # hidden layer 2
        h2 = jnp.dot(h1.astype(mxu_dtype), w2_ref[...],
                     preferred_element_type=jnp.float32)
        h2 = jnp.maximum(h2.astype(act_dtype) + b2_ref[...], 0)

        # actor head: Linear + numerically stable Softmax(-1), kept in f32
        logits = jnp.dot(h2.astype(mxu_dtype), w3_ref[...],
                         preferred_element_type=jnp.float32)
        logits = logits + b3_ref[...]
        m = jnp.max(logits, axis=-1, keepdims=True)
        e = jnp.exp(logits - m)
        denom = jnp.sum(e, axis=-1, keepdims=True)
        # Exact divide: approx reciprocal (EUP vrcp) leaves ~1e-4 relative
        # error in row sums, which broke exact-normalization checks downstream.
        o_ref[...] = (e / denom).astype(o_ref.dtype)

    return policy_kernel


def _round_up(x, m):
    return ((x + m - 1) // m) * m


def _bf16_elementwise_default():
    """bf16 VALU exists on v6e/v7x; v5e (and unknown backends) stay in f32."""
    try:
        kind = jax.devices()[0].device_kind.lower()
    except Exception:
        return False
    return ("v6" in kind) or ("v7" in kind)


def policy_forward(states, params, *, block_batch=2048,
                   mxu_dtype=jnp.bfloat16, bf16_elementwise=None):
    """states: [B, state_dim] float32.

    Returns (action_probs [B, action_dim] float32, temperature, alpha).
    """
    if bf16_elementwise is None:
        bf16_elementwise = _bf16_elementwise_default()
    act_dtype = jnp.bfloat16 if bf16_elementwise else jnp.float32

    w1, b1 = params["w1"], params["b1"]
    w2, b2 = params["w2"], params["b2"]
    w3, b3 = params["w3"], params["b3"]

    B, state_dim = states.shape
    action_dim = w3.shape[1]

    x = states.astype(jnp.float32)   # kernel casts to mxu_dtype in-register
    if B <= 16:
        # One tiny tile: pad at most 15 rows (cheap), slice back afterwards.
        tb = _round_up(max(B, 1), 16)
        if tb != B:
            x = jnp.pad(x, ((0, tb - B), (0, 0)))
        grid_b = 1
        out_rows = tb
    else:
        # >= 2 grid steps so the "parallel" batch axis can be sharded across
        # both v7x TensorCores; a partial last block is masked by Pallas, so
        # no whole-array pad / output-slice HBM round trip is needed.
        tb = min(block_batch, _round_up(pl.cdiv(B, 2), 16))
        grid_b = pl.cdiv(B, tb)
        out_rows = B

    # One-time parameter casts (tiny arrays, ~26 KB total).
    w1c = w1.astype(mxu_dtype)
    w2c = w2.astype(mxu_dtype)
    w3c = w3.astype(mxu_dtype)
    b1_2d = b1.reshape(1, -1).astype(act_dtype)
    b2_2d = b2.reshape(1, -1).astype(act_dtype)
    b3_2d = b3.reshape(1, -1).astype(jnp.float32)   # softmax path stays f32

    # Weights/biases: same block index every step -> VMEM-resident, no re-DMA.
    def resident(arr):
        return pl.BlockSpec(arr.shape, lambda i: (0, 0))

    kernel = _make_policy_kernel(mxu_dtype, act_dtype)

    probs = pl.pallas_call(
        kernel,
        out_shape=jax.ShapeDtypeStruct((out_rows, action_dim), jnp.float32),
        grid=(grid_b,),
        in_specs=[
            pl.BlockSpec((tb, state_dim), lambda i: (i, 0)),   # states: tiled
            resident(w1c), resident(b1_2d),
            resident(w2c), resident(b2_2d),
            resident(w3c), resident(b3_2d),
        ],
        # TODO(synk): lane-dense output (fold 128//action_dim batch rows into
        # the 128 lanes, (tb, A) -> (tb*A//128, 128)) would replace the
        # 8-of-128-lane masked output stores with full-width stores, but the
        # minor-dim-folding reshape it needs is not reliably lowered by Mosaic
        # on all TPU generations, so it is intentionally left out here.
        out_specs=pl.BlockSpec((tb, action_dim), lambda i: (i, 0)),
        compiler_params=pltpu.CompilerParams(
            dimension_semantics=("parallel",)),  # v7x: batch over both TCs
    )(x, w1c, b1_2d, w2c, b2_2d, w3c, b3_2d)

    if out_rows != B:
        probs = probs[:B]
    return probs, params["temperature"], params["alpha"]


def init_params(key, state_dim, action_dim):
    """Deterministic init mimicking nn.Linear default (uniform +/- 1/sqrt(fan_in))."""
    ks = jax.random.split(key, 6)

    def linear(kw, kb, fan_in, fan_out):
        bound = 1.0 / jnp.sqrt(fan_in)
        w = jax.random.uniform(kw, (fan_in, fan_out), jnp.float32, -bound, bound)
        b = jax.random.uniform(kb, (fan_out,), jnp.float32, -bound, bound)
        return w, b

    w1, b1 = linear(ks[0], ks[1], state_dim, 64)
    w2, b2 = linear(ks[2], ks[3], 64, 64)
    w3, b3 = linear(ks[4], ks[5], 64, action_dim)
    return {
        "w1": w1, "b1": b1, "w2": w2, "b2": b2, "w3": w3, "b3": b3,
        "temperature": jnp.array([1.0], jnp.float32),
        "alpha": jnp.array([1.0], jnp.float32),
    }


if __name__ == "__main__":
    state_dim = 32
    action_dim = 8
    batch = 8

    key = jax.random.PRNGKey(0)
    k_params, k_states = jax.random.split(key)
    params = init_params(k_params, state_dim, action_dim)
    states = jax.random.normal(k_states, (batch, state_dim), jnp.float32)

    bf16_elem = _bf16_elementwise_default()
    probs, temperature, alpha = policy_forward(
        states, params, bf16_elementwise=bf16_elem)
    jax.block_until_ready((probs, temperature, alpha))

    # sanity: shape, exact-ish normalization, parameter passthrough
    assert probs.shape == (batch, action_dim)
    row_sums = jnp.sum(probs, axis=-1)
    assert jnp.allclose(row_sums, 1.0, atol=1e-4), row_sums
    assert temperature.shape == (1,) and alpha.shape == (1,)

    # Pure-JAX reference that follows the kernel's compute path (bf16 MXU
    # operands, f32 accumulation, matching elementwise dtype).
    act_dt = jnp.bfloat16 if bf16_elem else jnp.float32

    def ref(x, p, mxu=jnp.bfloat16, act=act_dt):
        h = jnp.dot(x.astype(mxu), p["w1"].astype(mxu),
                    preferred_element_type=jnp.float32)
        h = jnp.maximum(h.astype(act) + p["b1"].astype(act), 0)
        h = jnp.dot(h.astype(mxu), p["w2"].astype(mxu),
                    preferred_element_type=jnp.float32)
        h = jnp.maximum(h.astype(act) + p["b2"].astype(act), 0)
        logits = jnp.dot(h.astype(mxu), p["w3"].astype(mxu),
                         preferred_element_type=jnp.float32) + p["b3"]
        return jax.nn.softmax(logits, axis=-1)

    assert jnp.allclose(probs, ref(states, params), atol=1e-2)

    print("KERNEL_OK")
</pallas_src>

<mosaic_0001>
module attributes {stable_mosaic.version = 11 : i64} {
  func.func @policy_kernel(%arg0: i32, %arg1: memref<16x32xf32, #tpu.memory_space<vmem>>, %arg2: memref<32x64xbf16, #tpu.memory_space<vmem>>, %arg3: memref<1x64xf32, #tpu.memory_space<vmem>>, %arg4: memref<64x64xbf16, #tpu.memory_space<vmem>>, %arg5: memref<1x64xf32, #tpu.memory_space<vmem>>, %arg6: memref<64x8xbf16, #tpu.memory_space<vmem>>, %arg7: memref<1x8xf32, #tpu.memory_space<vmem>>, %arg8: memref<16x8xf32, #tpu.memory_space<vmem>>) attributes {dimension_semantics = [#tpu.dimension_semantics<parallel>], iteration_bounds = array<i64: 1>, scalar_prefetch = 0 : i64, scratch_operands = 0 : i64, tpu.core_type = #tpu.core_type<tc>, window_params = [{transform_indices = @transform_0, window_bounds = array<i64: 16, 32>}, {pipeline_mode = #tpu.pipeline_mode<synchronous>, transform_indices = @transform_1, window_bounds = array<i64: 32, 64>}, {pipeline_mode = #tpu.pipeline_mode<synchronous>, transform_indices = @transform_2, window_bounds = array<i64: 1, 64>}, {pipeline_mode = #tpu.pipeline_mode<synchronous>, transform_indices = @transform_3, window_bounds = array<i64: 64, 64>}, {pipeline_mode = #tpu.pipeline_mode<synchronous>, transform_indices = @transform_4, window_bounds = array<i64: 1, 64>}, {pipeline_mode = #tpu.pipeline_mode<synchronous>, transform_indices = @transform_5, window_bounds = array<i64: 64, 8>}, {pipeline_mode = #tpu.pipeline_mode<synchronous>, transform_indices = @transform_6, window_bounds = array<i64: 1, 8>}, {transform_indices = @transform_7, window_bounds = array<i64: 16, 8>}]} {
    %c0 = arith.constant 0 : index
    %c0_0 = arith.constant 0 : index
    %0 = vector.load %arg1[%c0, %c0_0] : memref<16x32xf32, #tpu.memory_space<vmem>>, vector<16x32xf32>
    %1 = arith.truncf %0 : vector<16x32xf32> to vector<16x32xbf16>
    %c0_1 = arith.constant 0 : index
    %c0_2 = arith.constant 0 : index
    %2 = vector.load %arg2[%c0_1, %c0_2] : memref<32x64xbf16, #tpu.memory_space<vmem>>, vector<32x64xbf16>
    %cst = arith.constant dense<0.000000e+00> : vector<16x64xf32>
    %3 = tpu.matmul %1, %2, %cst {dimension_numbers = #tpu.dot_dimension_numbers<[1], [0], [0], [1], [0, 0, 1, 1], [], []>} : vector<16x32xbf16>, vector<32x64xbf16>, vector<16x64xf32> -> vector<16x64xf32>
    %c0_3 = arith.constant 0 : index
    %c0_4 = arith.constant 0 : index
    %4 = vector.load %arg3[%c0_3, %c0_4] : memref<1x64xf32, #tpu.memory_space<vmem>>, vector<1x64xf32>
    %5 = vector.broadcast %4 : vector<1x64xf32> to vector<16x64xf32>
    %6 = arith.addf %3, %5 : vector<16x64xf32>
    %cst_5 = arith.constant 0.000000e+00 : f32
    %7 = vector.broadcast %cst_5 : f32 to vector<16x64xf32>
    %8 = arith.maximumf %6, %7 : vector<16x64xf32>
    %9 = arith.truncf %8 : vector<16x64xf32> to vector<16x64xbf16>
    %c0_6 = arith.constant 0 : index
    %c0_7 = arith.constant 0 : index
    %10 = vector.load %arg4[%c0_6, %c0_7] : memref<64x64xbf16, #tpu.memory_space<vmem>>, vector<64x64xbf16>
    %cst_8 = arith.constant dense<0.000000e+00> : vector<16x64xf32>
    %11 = tpu.matmul %9, %10, %cst_8 {dimension_numbers = #tpu.dot_dimension_numbers<[1], [0], [0], [1], [0, 0, 1, 1], [], []>} : vector<16x64xbf16>, vector<64x64xbf16>, vector<16x64xf32> -> vector<16x64xf32>
    %c0_9 = arith.constant 0 : index
    %c0_10 = arith.constant 0 : index
    %12 = vector.load %arg5[%c0_9, %c0_10] : memref<1x64xf32, #tpu.memory_space<vmem>>, vector<1x64xf32>
    %13 = vector.broadcast %12 : vector<1x64xf32> to vector<16x64xf32>
    %14 = arith.addf %11, %13 : vector<16x64xf32>
    %cst_11 = arith.constant 0.000000e+00 : f32
    %15 = vector.broadcast %cst_11 : f32 to vector<16x64xf32>
    %16 = arith.maximumf %14, %15 : vector<16x64xf32>
    %17 = arith.truncf %16 : vector<16x64xf32> to vector<16x64xbf16>
    %c0_12 = arith.constant 0 : index
    %c0_13 = arith.constant 0 : index
    %18 = vector.load %arg6[%c0_12, %c0_13] : memref<64x8xbf16, #tpu.memory_space<vmem>>, vector<64x8xbf16>
    %cst_14 = arith.constant dense<0.000000e+00> : vector<16x8xf32>
    %19 = tpu.matmul %17, %18, %cst_14 {dimension_numbers = #tpu.dot_dimension_numbers<[1], [0], [0], [1], [0, 0, 1, 1], [], []>} : vector<16x64xbf16>, vector<64x8xbf16>, vector<16x8xf32> -> vector<16x8xf32>
    %c0_15 = arith.constant 0 : index
    %c0_16 = arith.constant 0 : index
    %20 = vector.load %arg7[%c0_15, %c0_16] : memref<1x8xf32, #tpu.memory_space<vmem>>, vector<1x8xf32>
    %21 = vector.broadcast %20 : vector<1x8xf32> to vector<16x8xf32>
    %22 = arith.addf %19, %21 : vector<16x8xf32>
    %cst_17 = arith.constant dense<0xFF800000> : vector<16xf32>
    %23 = vector.multi_reduction <maximumf>, %22, %cst_17 [1] : vector<16x8xf32> to vector<16xf32>
    %24 = vector.shape_cast %23 : vector<16xf32> to vector<16x1xf32>
    %25 = vector.broadcast %24 : vector<16x1xf32> to vector<16x8xf32>
    %26 = arith.subf %22, %25 : vector<16x8xf32>
    %27 = math.exp %26 : vector<16x8xf32>
    %cst_18 = arith.constant dense<0.000000e+00> : vector<16xf32>
    %28 = vector.multi_reduction <add>, %27, %cst_18 [1] : vector<16x8xf32> to vector<16xf32>
    %29 = vector.shape_cast %28 : vector<16xf32> to vector<16x1xf32>
    %30 = vector.broadcast %29 : vector<16x1xf32> to vector<16x8xf32>
    %31 = arith.divf %27, %30 : vector<16x8xf32>
    %c0_19 = arith.constant 0 : index
    %c0_20 = arith.constant 0 : index
    %32 = vector.load %arg8[%c0_19, %c0_20] : memref<16x8xf32, #tpu.memory_space<vmem>>, vector<16x8xf32>
    tpu.vector_store %arg8[%c0_19, %c0_20], %31 {strides = array<i32>} : memref<16x8xf32, #tpu.memory_space<vmem>>, vector<16x8xf32>,
    return
  }
  func.func @transform_0(%arg0: i32) -> (i32, i32) {
    %c0_i32 = arith.constant 0 : i32
    %c0_i32_0 = arith.constant 0 : i32
    return %arg0, %c0_i32 : i32, i32
  }
  func.func @transform_1(%arg0: i32) -> (i32, i32) {
    %c0_i32 = arith.constant 0 : i32
    %c0_i32_0 = arith.constant 0 : i32
    %c0_i32_1 = arith.constant 0 : i32
    return %c0_i32, %c0_i32_0 : i32, i32
  }
  func.func @transform_2(%arg0: i32) -> (i32, i32) {
    %c0_i32 = arith.constant 0 : i32
    %c0_i32_0 = arith.constant 0 : i32
    %c0_i32_1 = arith.constant 0 : i32
    return %c0_i32, %c0_i32_0 : i32, i32
  }
  func.func @transform_3(%arg0: i32) -> (i32, i32) {
    %c0_i32 = arith.constant 0 : i32
    %c0_i32_0 = arith.constant 0 : i32
    %c0_i32_1 = arith.constant 0 : i32
    return %c0_i32, %c0_i32_0 : i32, i32
  }
  func.func @transform_4(%arg0: i32) -> (i32, i32) {
    %c0_i32 = arith.constant 0 : i32
    %c0_i32_0 = arith.constant 0 : i32
    %c0_i32_1 = arith.constant 0 : i32
    return %c0_i32, %c0_i32_0 : i32, i32
  }
  func.func @transform_5(%arg0: i32) -> (i32, i32) {
    %c0_i32 = arith.constant 0 : i32
    %c0_i32_0 = arith.constant 0 : i32
    %c0_i32_1 = arith.constant 0 : i32
    return %c0_i32, %c0_i32_0 : i32, i32
  }
  func.func @transform_6(%arg0: i32) -> (i32, i32) {
    %c0_i32 = arith.constant 0 : i32
    %c0_i32_0 = arith.constant 0 : i32
    %c0_i32_1 = arith.constant 0 : i32
    return %c0_i32, %c0_i32_0 : i32, i32
  }
  func.func @transform_7(%arg0: i32) -> (i32, i32) {
    %c0_i32 = arith.constant 0 : i32
    %c0_i32_0 = arith.constant 0 : i32
    return %arg0, %c0_i32 : i32, i32
  }
}

</mosaic_0001>

<bundles_post_ra>
// kernel: tpu_custom_call.1
= control target key start
LH: loop header
LB: loop body
LE: loop exit
PB: predicated region body
PF: predicated region fallthrough
CT: control target
= control target key end

     0   :  { %12 = vsyncpa [#allocation3], 0  ;;  %s565_s0 = inlined_call_operand.hbm [shape: f32[16,32], index: 0, kind: input, shape index: {}]   ;;  %s566_s1 = inlined_call_operand.hbm [shape: bf16[32,64], index: 1, kind: input, shape index: {}]   ;;  %s567_s2 = inlined_call_operand.vmem [shape: f32[1,64], index: 2, kind: input, shape index: {}]   ;;  %s568_s3 = inlined_call_operand.vmem [shape: bf16[64,64], index: 3, kind: input, shape index: {}]   ;;  %s569_s4 = inlined_call_operand.vmem [shape: f32[1,64], index: 4, kind: input, shape index: {}]   ;;  %s570_s5 = inlined_call_operand.vmem [shape: bf16[64,8], index: 5, kind: input, shape index: {}]   ;;  %s571_s6 = inlined_call_operand.vmem [shape: f32[1,8], index: 6, kind: input, shape index: {}]   ;;  %s572_s7 = inlined_call_operand.vmem [shape: f32[16,8], index: 7, kind: output, shape index: {}]  }
   0x1   :  { %13 = vsyncpa [#allocation5], 0  ;;  %s461_s24 = smov [#allocation2]  }
   0x2   :  { %s19_s25 = sshll.u32 %s461_s24, 4  ;;  %s20_s25 = int_to_ptr.vmem [resolvable:$true] %s19_s25 }
   0x3   :  { %s425_s26 = scalar_lea.vmem %s20_s25, 256  ;;  %p430_p1 = scmp.lt.s32.totalorder %s20_s25, %s20_s25 }
   0x4   :  { %p426_p0 = scmp.ne.s32.totalorder %s20_s25, %s425_s26  ;;  %p431_p2 = scmp.lt.s32.totalorder %s425_s26, %s425_s26 }
   0x6   :  { %p432_p3 = por %p431_p2, %p430_p1 }
   0x8   :  { %p433_p4 = pnand %p432_p3, %p426_p0 }
   0xa   :  { %436 = shalt.err (!%p433_p4)
}
   0xb   :  { %s462_s27 = smov 128   ;;  %s463_s28 = smov 8  }
   0xc   :  { %25 = dma.hbm_to_vmem [thread:$0]  %s565_s0, 256, %s20_s25, [#allocation3], %s462_s27, %s462_s27, %s463_s28  }
   0xd   :  { %s464_s8 = smov [#allocation4]  }
   0xe   :  { %s31_s9 = sshll.u32 %s464_s8, 4  ;;  %s32_s9 = int_to_ptr.vmem [resolvable:$true] %s31_s9 }
   0xf   :  { %s445_s10 = scalar_lea.vmem %s32_s9, 256  ;;  %p450_p6 = scmp.lt.s32.totalorder %s32_s9, %s32_s9 }
  0x10   :  { %p446_p5 = scmp.ne.s32.totalorder %s32_s9, %s445_s10  ;;  %p451_p7 = scmp.lt.s32.totalorder %s445_s10, %s445_s10 }
  0x12   :  { %p452_p8 = por %p451_p7, %p450_p6 }
  0x14   :  { %p453_p9 = pnand %p452_p8, %p446_p5 }
  0x16   :  { %456 = shalt.err (!%p453_p9)
}
  0x17   :  { %s465_s11 = smov 64   ;;  %s466_s12 = smov 4  }
  0x18   :  { %37 = dma.hbm_to_vmem [thread:$0]  %s566_s1, 256, %s32_s9, [#allocation5], %s465_s11, %s465_s11, %s466_s12  }
  0x19   :  { %457 = dma.done.wait [#allocation3], 256  }
  0x1a   :  { %458 = vsyncadd [#allocation3], 4294967040 }
  0x1b   :  { %459 = dma.done.wait [#allocation5], 256  }
  0x1c   :  { %460 = vsyncadd [#allocation5], 4294967040  ;;  %v467_v0 = vmov 0.0   ;;  %vm468_vm0 = vmmov 0   ;;  %v399_v1 = vld [vmem:[#allocation4 + $0x8] sm:$0xff]   ;;  %v400_v2 = vld [vmem:[#allocation4] sm:$0xff]  }
  0x1d   :  { %359 = vmatprep.subr.bf16.mxu0 %v467_v0  ;;  %363 = vmatprep.mubr.msk.bf16.mxu0 %vm468_vm0, %v467_v0  ;;  %v55_v3 = vld [vmem:[#allocation2] sm:$0xff]  ;;  %v56_v4 = vld [vmem:[#allocation2 + $0x8] sm:$0xff]  ;;  %vm81_vm1 = vcmask 261120   ;;  %v401_v5 = vld [vmem:[%s568_s3 + $0x18] sm:$0xff]   ;;  %vm168_vm2 = vcmask 523264   ;;  %vm299_vm3 = vcmask 64512  }
  0x1e   :  { %367 = vmatprep.subr.bf16.mxu1 %v467_v0  ;;  %375 = vmatprep.mubr.msk.bf16.mxu1 %vm468_vm0, %v467_v0  ;;  %v57_v6 = vpack.c.bf16 %v56_v4, %v55_v3  ;;  %v402_v7 = vld [vmem:[%s568_s3 + $0x10] sm:$0xff]   ;;  %v403_v8 = vld [vmem:[%s568_s3 + $0x8] sm:$0xff]   ;;  %v404_v9 = vld [vmem:[%s568_s3] sm:$0xff]  }
  0x1f   :  { %360 = vmatpush3.bf16.msra.mxu0 %v399_v1  ;;  %368 = vmatpush3.bf16.msra.mxu1 %v401_v5  ;;  %v405_v10 = vld [vmem:[%s570_s5 + $0x18] sm:$0xff]   ;;  %v330_v11 = vld [vmem:[%s567_s2] ss:$0 sm:$0xff]  ;;  %v406_v21 = vld [vmem:[%s570_s5 + $0x10] sm:$0xff]  }
  0x20   :  { %361 = vmatprep.subr.bf16.mxu0 %v467_v0  ;;  %369 = vmatprep.subr.bf16.mxu1 %v467_v0  ;;  %v407_v22 = vld [vmem:[%s570_s5 + $0x8] sm:$0xff]   ;;  %v408_v23 = vld [vmem:[%s570_s5] sm:$0xff]  }
  0x21   :  { %v334_v24 = vld [vmem:[%s569_s4] ss:$0 sm:$0xff] }
  0x22   :  { %v340_v34 = vld [vmem:[%s571_s6] ss:$0 sm:$0xff] }
  0x23   :  { %362 = vmatpush3.bf16.msra.mxu0 %v400_v2  ;;  %370 = vmatpush3.bf16.msra.mxu1 %v402_v7 }
  0x24   :  { %379 = vmatprep.subr.bf16.mxu0 %v467_v0  ;;  %371 = vmatprep.subr.bf16.mxu1 %v467_v0 }
  0x26   :  { %364 = vmatmul.mubr.msk.bf16.vlgmr.msra.gmra.mxu0 %vm81_vm1, %v57_v6 }
  0x27   :  { %387 = vmatprep.mubr.msk.bf16.mxu0 %vm468_vm0, %v467_v0  ;;  %372 = vmatpush3.bf16.msra.mxu1 %v403_v8 }
  0x28   :  { %373 = vmatprep.subr.bf16.mxu1 %v467_v0  ;;  %380 = vmatpush3.bf16.msra.mxu0 %v405_v10 }
  0x29   :  { %381 = vmatprep.subr.bf16.mxu0 %v467_v0 }
  0x2b   :  { %374 = vmatpush3.bf16.msra.mxu1 %v404_v9 }
  0x2c   :  { %382 = vmatpush3.bf16.msra.mxu0 %v406_v21 }
  0x2d   :  { %383 = vmatprep.subr.bf16.mxu0 %v467_v0 }
  0x30   :  { %384 = vmatpush3.bf16.msra.mxu0 %v407_v22 }
  0x31   :  { %385 = vmatprep.subr.bf16.mxu0 %v467_v0 }
  0x34   :  { %386 = vmatpush3.bf16.msra.mxu0 %v408_v23 }
  0xe6   :  { %v119_v12 = vpop.f32.mrf.mxu0 }
  0xe7   :  { %v120_v14 = vadd.f32 %v330_v11, %v119_v12 }
  0xe8   :  { %v365_v13 = vpop.f32.mrf.mxu0 }
  0xe9   :  { %v126_v18 = vmax.f32 %v120_v14, 0.0 }
  0xea   :  { %v122_v15 = vpop.f32.mrf.mxu0 }
  0xeb   :  { %v123_v16 = vadd.f32 %v330_v11, %v122_v15 }
  0xec   :  { %v366_v17 = vpop.f32.mrf.mxu0 }
  0xed   :  { %v127_v19 = vmax.f32 %v123_v16, 0.0 }
  0xef   :  { %v128_v20 = vpack.c.bf16 %v127_v19, %v126_v18 }
  0xf1   :  { %376 = vmatmul.mubr.msk.bf16.vlgmr.msra.gmra.mxu1 %vm168_vm2, %v128_v20 }
 0x1b1   :  { %v206_v25 = vpop.f32.mrf.mxu1 }
 0x1b2   :  { %v207_v27 = vadd.f32 %v334_v24, %v206_v25 }
 0x1b3   :  { %v377_v26 = vpop.f32.mrf.mxu1 }
 0x1b4   :  { %v213_v31 = vmax.f32 %v207_v27, 0.0 }
 0x1b5   :  { %v209_v28 = vpop.f32.mrf.mxu1 }
 0x1b6   :  { %v210_v29 = vadd.f32 %v334_v24, %v209_v28 }
 0x1b7   :  { %v378_v30 = vpop.f32.mrf.mxu1 }
 0x1b8   :  { %v214_v32 = vmax.f32 %v210_v29, 0.0 }
 0x1ba   :  { %v215_v33 = vpack.c.bf16 %v214_v32, %v213_v31 }
 0x1bc   :  { %388 = vmatmul.mubr.msk.bf16.vlgmr.msra.gmra.mxu0 %vm168_vm2, %v215_v33 }
 0x27c   :  { %v292_v35 = vpop.f32.mrf.mxu0 }
 0x27d   :  { %v293_v36 = vadd.f32 %v340_v34, %v292_v35 }
 0x27e   :  { %v389_v37 = vpop.f32.mrf.mxu0 }
 0x27f   :  { %v300_v38 = vsel %vm299_vm3, %v293_v36, -inf }
 0x280   :  { %301 = vmax.xlane.f32.xlu0 %v300_v38  ;;  %v295_v39 = vpop.f32.mrf.mxu0 }
 0x281   :  { %v296_v40 = vadd.f32 %v340_v34, %v295_v39 }
 0x282   :  { %v390_v41 = vpop.f32.mrf.mxu0 }
 0x283   :  { %v303_v42 = vsel %vm299_vm3, %v296_v40, -inf }
 0x284   :  { %304 = vmax.xlane.f32.xlu0 %v303_v42 }
 0x309   :  { %v302_v43 = vpop.xlane.xlu0 %301 }
 0x30a   :  { %v306_v44 = vsub.f32 %v293_v36, %v302_v43 }
 0x30c   :  { %v308_v45 = vmul.f32 1.442695, %v306_v44 }
 0x30d   :  { %v305_v46 = vpop.xlane.xlu0 %304 }
 0x30e   :  { %409 = vpow2.f32 %v308_v45  ;;  %v307_v47 = vsub.f32 %v296_v40, %v305_v46 }
 0x310   :  { %v310_v48 = vmul.f32 1.442695, %v307_v47 }
 0x312   :  { %411 = vpow2.f32 %v310_v48 }
 0x31b   :  { %v410_v49 = vpop.eup %409 }
 0x31c   :  { %v312_v50 = vsel %vm299_vm3, %v410_v49, 0.0 }
 0x31d   :  { %313 = vadd.xlane.f32.xlu1 %v312_v50 }
 0x31f   :  { %v412_v51 = vpop.eup %411 }
 0x320   :  { %v315_v52 = vsel %vm299_vm3, %v412_v51, 0.0 }
 0x321   :  { %316 = vadd.xlane.f32.xlu1 %v315_v52 }
 0x3a6   :  { %v314_v53 = vpop.xlane.xlu1 %313 }
 0x3a7   :  { %413 = vrcp.f32 %v314_v53 }
 0x3aa   :  { %v317_v54 = vpop.xlane.xlu1 %316 }
 0x3ab   :  { %415 = vrcp.f32 %v317_v54 }
 0x3b4   :  { %v414_v55 = vpop.eup %413 }
 0x3b5   :  { %v319_v56 = vmul.f32 %v414_v55, %v410_v49 }
 0x3b7   :  { %322 = vst.msk [vmem:[%s572_s7] sm:$0xff] %vm299_vm3, %v319_v56 }
 0x3b8   :  { %v416_v57 = vpop.eup %415 }
 0x3b9   :  { %v321_v58 = vmul.f32 %v416_v57, %v412_v51 }
 0x3bb   :  { %323 = vst.msk [vmem:[%s572_s7 + $0x8] sm:$0xff] %vm299_vm3, %v321_v58 }
 0x3bc   :  { %328 = vsyncpa [#allocation3], 1 }
 0x3bd   :  { %329 = vsyncpa [#allocation5], 1 }

</bundles_post_ra>
